<compile_context>
chip_gen: v6e
topology: v6e:2x2x1
jax: 0.10.0
libtpu: 0.0.40
codegen_flags: <defaults>
</compile_context>

<pallas_src>
import jax
import jax.numpy as jnp
from jax.experimental import pallas as pl
from jax.experimental.pallas import tpu as pltpu

_LANE = 128
_SUBLANE = 8
_TARGET_BLOCK_BYTES = 2 * 1024 * 1024   # ~2 MiB/block; 4 live buffers ~ 8 MiB VMEM
_FAST_PATH_BYTES = 4 * 1024             # below this, XLA fused maximum is faster


def _relu_kernel(x_ref, o_ref):
    # Pure VPU elementwise max over the whole VMEM tile; kernel is HBM-bound.
    x = x_ref[...]
    o_ref[...] = jnp.maximum(x, jnp.zeros((), dtype=x.dtype))


def _relu_2d(x2: jax.Array) -> jax.Array:
    """Run the Pallas ReLU kernel on a lane-dense 2D (rows, cols) slab."""
    rows, cols = x2.shape
    itemsize = jnp.dtype(x2.dtype).itemsize

    # Size the block by bytes (~2 MiB), keep the sublane dim a multiple of 8
    # unless it spans the full row extent.
    tr = _TARGET_BLOCK_BYTES // max(1, cols * itemsize)
    tr = max(_SUBLANE, (tr // _SUBLANE) * _SUBLANE)
    if tr >= rows:
        tr = rows  # full extent is always a legal block dim

    grid = (pl.cdiv(rows, tr),)  # ragged last block -> masked writeback

    return pl.pallas_call(
        _relu_kernel,
        out_shape=jax.ShapeDtypeStruct((rows, cols), x2.dtype),
        grid_spec=pltpu.PrefetchScalarGridSpec(
            num_scalar_prefetch=0,
            grid=grid,
            in_specs=[pl.BlockSpec((tr, cols), lambda i: (i, 0))],
            out_specs=pl.BlockSpec((tr, cols), lambda i: (i, 0)),
        ),
        compiler_params=pltpu.CompilerParams(
            dimension_semantics=("parallel",),
        ),
    )(x2)


def my_relu(x: jax.Array) -> jax.Array:
    """ReLU via a Pallas TPU kernel. Matches torch.nn.functional.relu(x)."""
    orig_shape = x.shape
    dtype = x.dtype
    n = x.size
    itemsize = jnp.dtype(dtype).itemsize

    # Small / zero-sized inputs: launch overhead dominates, skip the kernel.
    if n == 0 or n * itemsize < _FAST_PATH_BYTES:
        return jnp.maximum(x, jnp.zeros((), dtype=dtype))

    xf = x.reshape(-1)

    # Pick the largest lane-dense column width that divides the flat length.
    cols = None
    if n % _LANE == 0:
        for c in (8192, 4096, 2048, 1024, 512, 256, 128):
            if n % c == 0:
                cols = c
                break

    if cols is not None:
        out = _relu_2d(xf.reshape(n // cols, cols))
        return out.reshape(orig_shape)

    # Flat length not a multiple of 128: pad the tail (<= 1023 zeros, benign
    # for ReLU), run lane-dense, slice back.
    cols = 1024
    pad = (-n) % cols
    xp = jnp.pad(xf, (0, pad))
    out = _relu_2d(xp.reshape((n + pad) // cols, cols))
    return out.reshape(-1)[:n].reshape(orig_shape)


if __name__ == "__main__":
    key = jax.random.PRNGKey(0)
    test_cases = [
        ((2, 4, 16, 16), jnp.float32),   # NCHW-style; lane-dense slab, no pad
        ((2, 4, 16, 16), jnp.bfloat16),  # sub-32-bit dtype
        ((25, 41), jnp.float32),         # ragged flat length -> padded branch
        ((3, 5, 7), jnp.float32),        # tiny -> fast path
    ]
    for shape, dt in test_cases:
        key, sub = jax.random.split(key)
        x = jax.random.normal(sub, shape, dtype=dt)
        y = my_relu(x)
        jax.block_until_ready(y)
        y_ref = jnp.maximum(x, jnp.zeros((), dtype=dt))
        assert y.shape == x.shape and y.dtype == x.dtype
        assert bool(jnp.array_equal(y, y_ref)), f"mismatch vs reference relu for {shape} {dt}"
    print("KERNEL_OK")
</pallas_src>

<mosaic_0001>
module attributes {stable_mosaic.version = 11 : i64} {
  func.func @_relu_kernel(%arg0: i32, %arg1: memref<1x2048xf32, #tpu.memory_space<vmem>>, %arg2: memref<1x2048xf32, #tpu.memory_space<vmem>>) attributes {dimension_semantics = [#tpu.dimension_semantics<parallel>], iteration_bounds = array<i64: 1>, scalar_prefetch = 0 : i64, scratch_operands = 0 : i64, tpu.core_type = #tpu.core_type<tc>, window_params = [{transform_indices = @transform_0, window_bounds = array<i64: 1, 2048>}, {transform_indices = @transform_1, window_bounds = array<i64: 1, 2048>}]} {
    %c0 = arith.constant 0 : index
    %c0_0 = arith.constant 0 : index
    %0 = vector.load %arg1[%c0, %c0_0] : memref<1x2048xf32, #tpu.memory_space<vmem>>, vector<1x2048xf32>
    %cst = arith.constant 0.000000e+00 : f32
    %1 = vector.broadcast %cst : f32 to vector<1x2048xf32>
    %2 = arith.maximumf %0, %1 : vector<1x2048xf32>
    %c0_1 = arith.constant 0 : index
    %c0_2 = arith.constant 0 : index
    %3 = vector.load %arg2[%c0_1, %c0_2] : memref<1x2048xf32, #tpu.memory_space<vmem>>, vector<1x2048xf32>
    tpu.vector_store %arg2[%c0_1, %c0_2], %2 {strides = array<i32>} : memref<1x2048xf32, #tpu.memory_space<vmem>>, vector<1x2048xf32>,
    return
  }
  func.func @transform_0(%arg0: i32) -> (i32, i32) {
    %c0_i32 = arith.constant 0 : i32
    %c0_i32_0 = arith.constant 0 : i32
    return %arg0, %c0_i32 : i32, i32
  }
  func.func @transform_1(%arg0: i32) -> (i32, i32) {
    %c0_i32 = arith.constant 0 : i32
    %c0_i32_0 = arith.constant 0 : i32
    return %arg0, %c0_i32 : i32, i32
  }
}

</mosaic_0001>

<bundles_post_ra>
// kernel: tpu_custom_call.1
= control target key start
LH: loop header
LB: loop body
LE: loop exit
PB: predicated region body
PF: predicated region fallthrough
CT: control target
= control target key end

     0   :  { %6 = vsyncpa [#allocation3], 0  ;;  %s106_s0 = inlined_call_operand.hbm [shape: f32[1,2048], index: 0, kind: input, shape index: {}]   ;;  %s107_s1 = inlined_call_operand.hbm [shape: f32[1,2048], index: 1, kind: output, shape index: {}]  }
   0x1   :  { %7 = vsyncpa [#allocation4], 0  ;;  %s88_s6 = smov [#allocation2]  }
   0x2   :  { %s14_s7 = sshll.u32 %s88_s6, 4  ;;  %s15_s7 = int_to_ptr.vmem [resolvable:$true] %s14_s7 }
   0x3   :  { %s52_s8 = scalar_lea.vmem %s15_s7, 256  ;;  %p57_p1 = scmp.lt.s32.totalorder %s15_s7, %s15_s7 }
   0x4   :  { %p53_p0 = scmp.ne.s32.totalorder %s15_s7, %s52_s8  ;;  %p58_p2 = scmp.lt.s32.totalorder %s52_s8, %s52_s8 }
   0x6   :  { %p59_p3 = por %p58_p2, %p57_p1 }
   0x8   :  { %p60_p4 = pnand %p59_p3, %p53_p0 }
   0xa   :  { %63 = shalt.err (!%p60_p4)
}
   0xb   :  { %17 = dma.hbm_to_vmem [thread:$0]  %s106_s0, 256, %s15_s7, [#allocation3]  }
   0xc   :  { %84 = dma.done.wait [#allocation3], 256  }
   0xd   :  { %85 = vsyncadd [#allocation3], 4294967040  ;;  %s89_s11 = smov [#allocation5]   ;;  %v21_v0 = vld [vmem:[#allocation2] sm:$0xff]  ;;  %v22_v1 = vld [vmem:[#allocation2 + $0x8] sm:$0xff] }
   0xe   :  { %s33_s12 = sshll.u32 %s89_s11, 4  ;;  %v23_v2 = vmax.f32 %v21_v0, 0.0  ;;  %v24_v3 = vmax.f32 %v22_v1, 0.0  ;;  %s34_s12 = int_to_ptr.vmem [resolvable:$true] %s33_s12 }
   0xf   :  { %s64_s13 = scalar_lea.vmem %s34_s12, 256  ;;  %p69_p6 = scmp.lt.s32.totalorder %s34_s12, %s34_s12 }
  0x10   :  { %25 = vst [vmem:[#allocation5] sm:$0xff] %v23_v2  ;;  %26 = vst [vmem:[#allocation5 + $0x8] sm:$0xff] %v24_v3  ;;  %p65_p5 = scmp.ne.s32.totalorder %s34_s12, %s64_s13  ;;  %p70_p7 = scmp.lt.s32.totalorder %s64_s13, %s64_s13 }
  0x12   :  { %p71_p8 = por %p70_p7, %p69_p6 }
  0x14   :  { %p72_p9 = pnand %p71_p8, %p65_p5 }
  0x16   :  { %75 = shalt.err (!%p72_p9)
}
  0x17   :  { %36 = dma.vmem_to_hbm [thread:$0]  %s34_s12, 256, %s107_s1, [#allocation4]  }
  0x18   :  { %86 = dma.done.wait [#allocation4], 256  }
  0x19   :  { %87 = vsyncadd [#allocation4], 4294967040 }
  0x1a   :  { %40 = vsyncpa [#allocation3], 1 }
  0x1b   :  { %41 = vsyncpa [#allocation4], 1 }

</bundles_post_ra>
